<compile_context>
chip_gen: v7x
topology: tpu7x:2x2x1
jax: 0.10.0
libtpu: 0.0.40
codegen_flags: <defaults>
</compile_context>

<pallas_src>
import jax
import jax.numpy as jnp
from jax.experimental import pallas as pl
from jax.experimental.pallas import tpu as pltpu

EPS = 1e-5
MAX_TILE_B = 256  # batch-tile rows; small enough for v7x 64 MiB VMEM budget


def _linres_kernel(x_ref, w1_ref, w2_ref, vec_ref, o_ref):
    """One LinRes block for one branch / one batch tile.

    x_ref : (TILE_B, F) f32      activations
    w1_ref: (F, F)      bf16     W1^T (pre-transposed)
    w2_ref: (F, F)      bf16     W2^T (pre-transposed)
    vec_ref:(8, F)      f32      rows 0..5 = b1, g1, be1, b2, g2, be2
    o_ref : (TILE_B, F) f32      output
    """
    x = x_ref[...].astype(jnp.float32)
    v = vec_ref[...]
    b1, g1, be1 = v[0:1, :], v[1:2, :], v[2:3, :]
    b2, g2, be2 = v[3:4, :], v[4:5, :], v[5:6, :]

    # ---- layer 1: Linear (bf16 MXU, f32 accumulate) + GN(ng=1) + affine + ReLU
    h = jnp.dot(x.astype(jnp.bfloat16), w1_ref[...],
                preferred_element_type=jnp.float32) + b1
    mu = jnp.mean(h, axis=-1, keepdims=True)
    var = jnp.maximum(jnp.mean(h * h, axis=-1, keepdims=True) - mu * mu, 0.0)
    h = (h - mu) * jax.lax.rsqrt(var + EPS) * g1 + be1
    h = jnp.maximum(h, 0.0)

    # ---- layer 2: Linear + GN(ng=1) + affine, residual add (n_in==n_out), ReLU
    h2 = jnp.dot(h.astype(jnp.bfloat16), w2_ref[...],
                 preferred_element_type=jnp.float32) + b2
    mu2 = jnp.mean(h2, axis=-1, keepdims=True)
    var2 = jnp.maximum(jnp.mean(h2 * h2, axis=-1, keepdims=True) - mu2 * mu2, 0.0)
    h2 = (h2 - mu2) * jax.lax.rsqrt(var2 + EPS) * g2 + be2

    o_ref[...] = jnp.maximum(h2 + x, 0.0).astype(o_ref.dtype)


def _choose_batch_tiling(batch):
    """Return (padded_batch, tile_b)."""
    bp = ((batch + 7) // 8) * 8                      # sublane alignment
    if bp <= MAX_TILE_B:
        return bp, bp
    bp = ((bp + MAX_TILE_B - 1) // MAX_TILE_B) * MAX_TILE_B
    return bp, MAX_TILE_B


@jax.jit
def target_graph_net_forward(features, params):
    """Equivalent of TargetGraphNet.forward: returns (latent_pi, latent_vf).

    features: (B, F) f32.
    params  : dict with "w1t"/"w2t" (2, F, F) bf16 (pre-transposed; 0=policy,
              1=value) and "vecs" (2, 8, F) f32.
    """
    B, F = features.shape
    Bp, tile_b = _choose_batch_tiling(B)
    x = features if Bp == B else jnp.pad(features, ((0, Bp - B), (0, 0)))
    grid_b = Bp // tile_b

    out = pl.pallas_call(
        _linres_kernel,
        out_shape=jax.ShapeDtypeStruct((2, Bp, F), features.dtype),
        grid=(2, grid_b),  # (branch, batch tile); branch outermost -> weights stay resident
        in_specs=[
            pl.BlockSpec((tile_b, F), lambda br, i: (i, 0)),      # x (shared by branches)
            pl.BlockSpec((None, F, F), lambda br, i: (br, 0, 0)),  # W1^T per branch
            pl.BlockSpec((None, F, F), lambda br, i: (br, 0, 0)),  # W2^T per branch
            pl.BlockSpec((None, 8, F), lambda br, i: (br, 0, 0)),  # packed bias/affine vectors
        ],
        out_specs=pl.BlockSpec((None, tile_b, F), lambda br, i: (br, i, 0)),
        compiler_params=pltpu.CompilerParams(
            dimension_semantics=("parallel", "parallel")),  # megacore split on v7x
    )(x, params["w1t"], params["w2t"], params["vecs"])

    return out[0, :B], out[1, :B]


def forward_actor(features, params):
    return target_graph_net_forward(features, params)[0]


def forward_critic(features, params):
    return target_graph_net_forward(features, params)[1]


def init_target_graph_net_params(key, features_dim):
    """Init both branches; pre-transpose + bf16-cast weights ONCE here."""
    F = features_dim
    bound = 1.0 / (F ** 0.5)

    def branch(k):
        k1, k2, k3, k4 = jax.random.split(k, 4)
        # nn.Linear default-ish init (uniform in [-1/sqrt(fan_in), 1/sqrt(fan_in)])
        w1 = jax.random.uniform(k1, (F, F), jnp.float32, -bound, bound)
        b1 = jax.random.uniform(k2, (F,), jnp.float32, -bound, bound)
        w2 = jax.random.uniform(k3, (F, F), jnp.float32, -bound, bound)
        b2 = jax.random.uniform(k4, (F,), jnp.float32, -bound, bound)
        # nn.GroupNorm default init: weight=1, bias=0
        g1, be1 = jnp.ones((F,), jnp.float32), jnp.zeros((F,), jnp.float32)
        g2, be2 = jnp.ones((F,), jnp.float32), jnp.zeros((F,), jnp.float32)
        vecs = jnp.zeros((8, F), jnp.float32)
        vecs = vecs.at[0].set(b1).at[1].set(g1).at[2].set(be1)
        vecs = vecs.at[3].set(b2).at[4].set(g2).at[5].set(be2)
        return w1.T.astype(jnp.bfloat16), w2.T.astype(jnp.bfloat16), vecs

    kp, kv = jax.random.split(key)
    p, v = branch(kp), branch(kv)
    return {
        "w1t": jnp.stack([p[0], v[0]]),   # (2, F, F) bf16
        "w2t": jnp.stack([p[1], v[1]]),   # (2, F, F) bf16
        "vecs": jnp.stack([p[2], v[2]]),  # (2, 8, F) f32
    }


def _linres_ref(x, w1t, w2t, vecs):
    """Pure-JAX reference with the same bf16-weight / f32-accumulate math."""
    b1, g1, be1 = vecs[0:1, :], vecs[1:2, :], vecs[2:3, :]
    b2, g2, be2 = vecs[3:4, :], vecs[4:5, :], vecs[5:6, :]
    h = jnp.dot(x.astype(jnp.bfloat16), w1t, preferred_element_type=jnp.float32) + b1
    mu = h.mean(-1, keepdims=True)
    var = ((h - mu) ** 2).mean(-1, keepdims=True)
    h = (h - mu) / jnp.sqrt(var + EPS) * g1 + be1
    h = jnp.maximum(h, 0.0)
    h2 = jnp.dot(h.astype(jnp.bfloat16), w2t, preferred_element_type=jnp.float32) + b2
    mu2 = h2.mean(-1, keepdims=True)
    var2 = ((h2 - mu2) ** 2).mean(-1, keepdims=True)
    h2 = (h2 - mu2) / jnp.sqrt(var2 + EPS) * g2 + be2
    return jnp.maximum(h2 + x, 0.0)


if __name__ == "__main__":
    key = jax.random.PRNGKey(0)
    k_x, k_p = jax.random.split(key)

    batch = 8
    features_dim = 128  # feature axis maps onto the 128-wide lane dimension

    features = jax.random.normal(k_x, (batch, features_dim), jnp.float32)
    params = init_target_graph_net_params(k_p, features_dim)

    latent_pi, latent_vf = target_graph_net_forward(features, params)
    jax.block_until_ready((latent_pi, latent_vf))

    # correctness check against a pure-JAX reference (same bf16-weight math)
    ref_pi = _linres_ref(features, params["w1t"][0], params["w2t"][0], params["vecs"][0])
    ref_vf = _linres_ref(features, params["w1t"][1], params["w2t"][1], params["vecs"][1])
    assert latent_pi.shape == (batch, features_dim)
    assert latent_vf.shape == (batch, features_dim)
    assert jnp.allclose(latent_pi, ref_pi, atol=1e-4, rtol=1e-4)
    assert jnp.allclose(latent_vf, ref_vf, atol=1e-4, rtol=1e-4)

    print("KERNEL_OK")
</pallas_src>

<mosaic_0001>
module attributes {stable_mosaic.version = 11 : i64} {
  func.func @_linres_kernel(%arg0: i32, %arg1: i32, %arg2: memref<8x128xf32, #tpu.memory_space<vmem>>, %arg3: memref<1x128x128xbf16, #tpu.memory_space<vmem>>, %arg4: memref<1x128x128xbf16, #tpu.memory_space<vmem>>, %arg5: memref<1x8x128xf32, #tpu.memory_space<vmem>>, %arg6: memref<1x8x128xf32, #tpu.memory_space<vmem>>) attributes {dimension_semantics = [#tpu.dimension_semantics<parallel>, #tpu.dimension_semantics<parallel>], iteration_bounds = array<i64: 2, 1>, scalar_prefetch = 0 : i64, scratch_operands = 0 : i64, tpu.core_type = #tpu.core_type<tc>, window_params = [{transform_indices = @transform_0, window_bounds = array<i64: 8, 128>}, {transform_indices = @transform_1, window_bounds = array<i64: 1, 128, 128>}, {transform_indices = @transform_2, window_bounds = array<i64: 1, 128, 128>}, {transform_indices = @transform_3, window_bounds = array<i64: 1, 8, 128>}, {transform_indices = @transform_4, window_bounds = array<i64: 1, 8, 128>}]} {
    %c0 = arith.constant 0 : index
    %c0_0 = arith.constant 0 : index
    %0 = vector.load %arg2[%c0, %c0_0] : memref<8x128xf32, #tpu.memory_space<vmem>>, vector<8x128xf32>
    %c0_1 = arith.constant 0 : index
    %c0_2 = arith.constant 0 : index
    %c0_3 = arith.constant 0 : index
    %1 = vector.load %arg5[%c0_1, %c0_2, %c0_3] : memref<1x8x128xf32, #tpu.memory_space<vmem>>, vector<1x8x128xf32>
    %2 = vector.shape_cast %1 : vector<1x8x128xf32> to vector<8x128xf32>
    %3 = vector.extract_strided_slice %2 {offsets = [0, 0], sizes = [1, 128], strides = [1, 1]} : vector<8x128xf32> to vector<1x128xf32>
    %4 = vector.extract_strided_slice %2 {offsets = [1, 0], sizes = [1, 128], strides = [1, 1]} : vector<8x128xf32> to vector<1x128xf32>
    %5 = vector.extract_strided_slice %2 {offsets = [2, 0], sizes = [1, 128], strides = [1, 1]} : vector<8x128xf32> to vector<1x128xf32>
    %6 = vector.extract_strided_slice %2 {offsets = [3, 0], sizes = [1, 128], strides = [1, 1]} : vector<8x128xf32> to vector<1x128xf32>
    %7 = vector.extract_strided_slice %2 {offsets = [4, 0], sizes = [1, 128], strides = [1, 1]} : vector<8x128xf32> to vector<1x128xf32>
    %8 = vector.extract_strided_slice %2 {offsets = [5, 0], sizes = [1, 128], strides = [1, 1]} : vector<8x128xf32> to vector<1x128xf32>
    %9 = arith.truncf %0 : vector<8x128xf32> to vector<8x128xbf16>
    %c0_4 = arith.constant 0 : index
    %c0_5 = arith.constant 0 : index
    %c0_6 = arith.constant 0 : index
    %10 = vector.load %arg3[%c0_4, %c0_5, %c0_6] : memref<1x128x128xbf16, #tpu.memory_space<vmem>>, vector<1x128x128xbf16>
    %11 = vector.shape_cast %10 : vector<1x128x128xbf16> to vector<128x128xbf16>
    %cst = arith.constant dense<0.000000e+00> : vector<8x128xf32>
    %12 = tpu.matmul %9, %11, %cst {dimension_numbers = #tpu.dot_dimension_numbers<[1], [0], [0], [1], [0, 0, 1, 1], [], []>} : vector<8x128xbf16>, vector<128x128xbf16>, vector<8x128xf32> -> vector<8x128xf32>
    %13 = vector.broadcast %3 : vector<1x128xf32> to vector<8x128xf32>
    %14 = arith.addf %12, %13 : vector<8x128xf32>
    %cst_7 = arith.constant dense<0.000000e+00> : vector<8xf32>
    %15 = vector.multi_reduction <add>, %14, %cst_7 [1] : vector<8x128xf32> to vector<8xf32>
    %16 = vector.shape_cast %15 : vector<8xf32> to vector<8x1xf32>
    %cst_8 = arith.constant 1.280000e+02 : f32
    %17 = vector.broadcast %cst_8 : f32 to vector<8x1xf32>
    %18 = arith.divf %16, %17 : vector<8x1xf32>
    %19 = arith.mulf %14, %14 : vector<8x128xf32>
    %cst_9 = arith.constant dense<0.000000e+00> : vector<8xf32>
    %20 = vector.multi_reduction <add>, %19, %cst_9 [1] : vector<8x128xf32> to vector<8xf32>
    %21 = vector.shape_cast %20 : vector<8xf32> to vector<8x1xf32>
    %cst_10 = arith.constant 1.280000e+02 : f32
    %22 = vector.broadcast %cst_10 : f32 to vector<8x1xf32>
    %23 = arith.divf %21, %22 : vector<8x1xf32>
    %24 = arith.mulf %18, %18 : vector<8x1xf32>
    %25 = arith.subf %23, %24 : vector<8x1xf32>
    %cst_11 = arith.constant 0.000000e+00 : f32
    %26 = vector.broadcast %cst_11 : f32 to vector<8x1xf32>
    %27 = arith.maximumf %25, %26 : vector<8x1xf32>
    %28 = vector.broadcast %18 : vector<8x1xf32> to vector<8x128xf32>
    %29 = arith.subf %14, %28 : vector<8x128xf32>
    %cst_12 = arith.constant 9.99999974E-6 : f32
    %30 = vector.broadcast %cst_12 : f32 to vector<8x1xf32>
    %31 = arith.addf %27, %30 : vector<8x1xf32>
    %32 = math.rsqrt %31 : vector<8x1xf32>
    %33 = vector.broadcast %32 : vector<8x1xf32> to vector<8x128xf32>
    %34 = arith.mulf %29, %33 : vector<8x128xf32>
    %35 = vector.broadcast %4 : vector<1x128xf32> to vector<8x128xf32>
    %36 = arith.mulf %34, %35 : vector<8x128xf32>
    %37 = vector.broadcast %5 : vector<1x128xf32> to vector<8x128xf32>
    %38 = arith.addf %36, %37 : vector<8x128xf32>
    %cst_13 = arith.constant 0.000000e+00 : f32
    %39 = vector.broadcast %cst_13 : f32 to vector<8x128xf32>
    %40 = arith.maximumf %38, %39 : vector<8x128xf32>
    %41 = arith.truncf %40 : vector<8x128xf32> to vector<8x128xbf16>
    %c0_14 = arith.constant 0 : index
    %c0_15 = arith.constant 0 : index
    %c0_16 = arith.constant 0 : index
    %42 = vector.load %arg4[%c0_14, %c0_15, %c0_16] : memref<1x128x128xbf16, #tpu.memory_space<vmem>>, vector<1x128x128xbf16>
    %43 = vector.shape_cast %42 : vector<1x128x128xbf16> to vector<128x128xbf16>
    %cst_17 = arith.constant dense<0.000000e+00> : vector<8x128xf32>
    %44 = tpu.matmul %41, %43, %cst_17 {dimension_numbers = #tpu.dot_dimension_numbers<[1], [0], [0], [1], [0, 0, 1, 1], [], []>} : vector<8x128xbf16>, vector<128x128xbf16>, vector<8x128xf32> -> vector<8x128xf32>
    %45 = vector.broadcast %6 : vector<1x128xf32> to vector<8x128xf32>
    %46 = arith.addf %44, %45 : vector<8x128xf32>
    %cst_18 = arith.constant dense<0.000000e+00> : vector<8xf32>
    %47 = vector.multi_reduction <add>, %46, %cst_18 [1] : vector<8x128xf32> to vector<8xf32>
    %48 = vector.shape_cast %47 : vector<8xf32> to vector<8x1xf32>
    %cst_19 = arith.constant 1.280000e+02 : f32
    %49 = vector.broadcast %cst_19 : f32 to vector<8x1xf32>
    %50 = arith.divf %48, %49 : vector<8x1xf32>
    %51 = arith.mulf %46, %46 : vector<8x128xf32>
    %cst_20 = arith.constant dense<0.000000e+00> : vector<8xf32>
    %52 = vector.multi_reduction <add>, %51, %cst_20 [1] : vector<8x128xf32> to vector<8xf32>
    %53 = vector.shape_cast %52 : vector<8xf32> to vector<8x1xf32>
    %cst_21 = arith.constant 1.280000e+02 : f32
    %54 = vector.broadcast %cst_21 : f32 to vector<8x1xf32>
    %55 = arith.divf %53, %54 : vector<8x1xf32>
    %56 = arith.mulf %50, %50 : vector<8x1xf32>
    %57 = arith.subf %55, %56 : vector<8x1xf32>
    %cst_22 = arith.constant 0.000000e+00 : f32
    %58 = vector.broadcast %cst_22 : f32 to vector<8x1xf32>
    %59 = arith.maximumf %57, %58 : vector<8x1xf32>
    %60 = vector.broadcast %50 : vector<8x1xf32> to vector<8x128xf32>
    %61 = arith.subf %46, %60 : vector<8x128xf32>
    %cst_23 = arith.constant 9.99999974E-6 : f32
    %62 = vector.broadcast %cst_23 : f32 to vector<8x1xf32>
    %63 = arith.addf %59, %62 : vector<8x1xf32>
    %64 = math.rsqrt %63 : vector<8x1xf32>
    %65 = vector.broadcast %64 : vector<8x1xf32> to vector<8x128xf32>
    %66 = arith.mulf %61, %65 : vector<8x128xf32>
    %67 = vector.broadcast %7 : vector<1x128xf32> to vector<8x128xf32>
    %68 = arith.mulf %66, %67 : vector<8x128xf32>
    %69 = vector.broadcast %8 : vector<1x128xf32> to vector<8x128xf32>
    %70 = arith.addf %68, %69 : vector<8x128xf32>
    %71 = arith.addf %70, %0 : vector<8x128xf32>
    %cst_24 = arith.constant 0.000000e+00 : f32
    %72 = vector.broadcast %cst_24 : f32 to vector<8x128xf32>
    %73 = arith.maximumf %71, %72 : vector<8x128xf32>
    %c0_25 = arith.constant 0 : index
    %c0_26 = arith.constant 0 : index
    %c0_27 = arith.constant 0 : index
    %74 = vector.load %arg6[%c0_25, %c0_26, %c0_27] : memref<1x8x128xf32, #tpu.memory_space<vmem>>, vector<1x8x128xf32>
    %75 = vector.shape_cast %74 : vector<1x8x128xf32> to vector<8x128xf32>
    %76 = vector.shape_cast %73 : vector<8x128xf32> to vector<1x8x128xf32>
    tpu.vector_store %arg6[%c0_25, %c0_26, %c0_27], %76 {strides = array<i32>} : memref<1x8x128xf32, #tpu.memory_space<vmem>>, vector<1x8x128xf32>,
    return
  }
  func.func @transform_0(%arg0: i32, %arg1: i32) -> (i32, i32) {
    %c0_i32 = arith.constant 0 : i32
    %c0_i32_0 = arith.constant 0 : i32
    return %arg1, %c0_i32 : i32, i32
  }
  func.func @transform_1(%arg0: i32, %arg1: i32) -> (i32, i32, i32) {
    %c0_i32 = arith.constant 0 : i32
    %c0_i32_0 = arith.constant 0 : i32
    %c0_i32_1 = arith.constant 0 : i32
    return %arg0, %c0_i32, %c0_i32_0 : i32, i32, i32
  }
  func.func @transform_2(%arg0: i32, %arg1: i32) -> (i32, i32, i32) {
    %c0_i32 = arith.constant 0 : i32
    %c0_i32_0 = arith.constant 0 : i32
    %c0_i32_1 = arith.constant 0 : i32
    return %arg0, %c0_i32, %c0_i32_0 : i32, i32, i32
  }
  func.func @transform_3(%arg0: i32, %arg1: i32) -> (i32, i32, i32) {
    %c0_i32 = arith.constant 0 : i32
    %c0_i32_0 = arith.constant 0 : i32
    %c0_i32_1 = arith.constant 0 : i32
    return %arg0, %c0_i32, %c0_i32_0 : i32, i32, i32
  }
  func.func @transform_4(%arg0: i32, %arg1: i32) -> (i32, i32, i32) {
    %c0_i32 = arith.constant 0 : i32
    %c0_i32_0 = arith.constant 0 : i32
    return %arg0, %arg1, %c0_i32 : i32, i32, i32
  }
}

</mosaic_0001>

<bundles_post_ra>
// kernel: target_graph_net_forward.1
= control target key start
LH: loop header
LB: loop body
LE: loop exit
PB: predicated region body
PF: predicated region fallthrough
CT: control target
= control target key end

     0   :  { %s1467_s0 = inlined_call_operand.hbm [shape: f32[8,128], index: 0, kind: input, shape index: {}]   ;;  %s1468_s1 = inlined_call_operand.hbm [shape: bf16[2,128,128], index: 1, kind: input, shape index: {}]   ;;  %s1469_s2 = inlined_call_operand.hbm [shape: bf16[2,128,128], index: 2, kind: input, shape index: {}]   ;;  %s1470_s3 = inlined_call_operand.hbm [shape: f32[2,8,128], index: 3, kind: input, shape index: {}]   ;;  %s1471_s4 = inlined_call_operand.vmem [shape: f32[2,8,128], index: 4, kind: output, shape index: {}]  }
   0x1   :  { %1481 = sst [smem:[#allocation12_spill]] %s1468_s1 }
   0x2   :  { %1482 = sst [smem:[#allocation13_spill]] %s1469_s2 }
   0x3   :  { %9 = vsyncpa [#allocation3], 0 }
   0x4   :  { %10 = vsyncpa [#allocation5], 0 }
   0x5   :  { %12 = vsyncpa [#allocation5 + $0x1], 0 }
   0x6   :  { %13 = vsyncpa [#allocation8], 0 }
   0x7   :  { %15 = vsyncpa [#allocation8 + $0x1], 0  ;;  %s1152_s15 = smov 0   ;;  %s1154_s16 = smov 0  }
   0x8   :  { %s1156_s17 = smov 0   ;;  %s1158_s18 = smov 0  }
   0x9   :  { %s1160_s19 = smov 0   ;;  %s1162_s20 = smov 0  }
   0xa LB: > { %s33_s21 = sadd.s32 1, %s1113_s19  ;;  %s66_s22 = sadd.s32 1, %s1105_s17  ;;  %s1117_s20 = sphi %s1162_s20, %s21_s20   ;;  %s1113_s19 = sphi %s1160_s19, %s1504_s19   ;;  %s1109_s18 = sphi %s1158_s18, %s1503_s18   ;;  %s1105_s17 = sphi %s1156_s17, %s1502_s17   ;;  %s1101_s16 = sphi %s1154_s16, %s1501_s16   ;;  %s1097_s15 = sphi %s1152_s15, %s1500_s15  }
   0xb   : > { %p35_p0 = scmp.ge.s32.totalorder %s33_s21, 2  ;;  %p73_p1 = scmp.ne.s32.totalorder %s1105_s17, %s1101_s16 }
   0xc   : > { %p74_p2 = scmp.eq.s32.totalorder %s1117_s20, 0  ;;  %p866_p4 = scmp.lt.s32.totalorder %s1117_s20, 2 }
   0xd   : > { %s1506_s21 = smov (%p35_p0, %s33_s21), 0  ;;  %s196_s24 = sand.u32 1, %s1117_s20  }
   0xe   : > { %p75_p3 = por %p74_p2, %p73_p1  ;;  %s63_s23 = ssub.s32 %s1113_s19, %s1506_s21 }
   0xf   : > { %p64_p5 = scmp.eq.s32.totalorder %s63_s23, 0  ;;  %s1194_s25 = sand.u32 1, %s1105_s17  }
  0x10   : > { %s781_s26 = sshll.u32 %s1113_s19, 10  ;;  %s749_s28 = sshll.u32 %s1194_s25, 6 }
  0x11   : > { %s1198_s27 = scalar_select %p64_p5, %s1105_s17, %s66_s22  }
  0x12   : > { %s1483_s1 = sld [smem:[#allocation12_spill]]  ;;  %p1208_p6 = pnand %p866_p4, %p75_p3 }
  0x13   : > { %s200_s7 = scalar_lea.vmem [#allocation4], %s749_s28  ;;  %s1216_s9 = scalar_lea.sflag [#allocation5], %s196_s24 }
  0x14   : > { %s1484_s6 = scalar_select %p1208_p6, 1, 0 }
  0x15   : > { %s207_s8 = sshll.u32 %s200_s7, 4  ;;  %p1222_p8 = pneg %p1208_p6  ;;  %s1214_s8 = int_to_ptr.vmem [resolvable:$true] %s207_s8 }
  0x17   : > { %s1485_s11 = scalar_select %p1222_p8, 1, 0 }
  0x18   : > { %s1206_s5 = scalar_lea.hbm %s1483_s1, %s781_s26  ;;  %s946_s14 = scalar_lea.hbm %s1483_s1, 2048 }
  0x19   : > { %s941_s10 = scalar_lea.hbm %s1206_s5, 1024  ;;  %p947_p11 = scmp.lt.u32.totalorder %s1206_s5, %s1483_s1 }
  0x1a   : > { %p942_p7 = scmp.ne.s32.totalorder %s1206_s5, %s941_s10  ;;  %p948_p12 = scmp.lt.u32.totalorder %s946_s14, %s941_s10 }
  0x1b   : > { %p950_p0 = scmp.lt.u32.totalorder %s941_s10, %s1206_s5 }
  0x1c   : > { %p944_p9 = pnand %p1222_p8, %p942_p7  ;;  %p949_p13 = por %p948_p12, %p947_p11 }
  0x1e   : > { %p945_p10 = pneg %p944_p9  ;;  %p951_p1 = por %p950_p0, %p949_p13 }
  0x20   : > { %p952_p2 = pnand %p951_p1, %p945_p10 }
  0x22   : > { %955 = shalt.err (!%p952_p2)
}
  0x23   : > { %s956_s24 = scalar_lea.vmem %s1214_s8, 1024  ;;  %s1119_s29 = smov [#allocation4]  }
  0x24   : > { %p957_p3 = scmp.ne.s32.totalorder %s1214_s8, %s956_s24  ;;  %s961_s30 = sshll.u32 %s1119_s29, 4  ;;  %s962_s30 = int_to_ptr.vmem [resolvable:$false] %s961_s30 }
  0x25   : > { %s963_s7 = scalar_lea.vmem %s962_s30, 2048  ;;  %p964_p7 = scmp.lt.s32.totalorder %s1214_s8, %s962_s30 }
  0x26   : > { %p959_p4 = pnand %p957_p3, %p1222_p8  ;;  %p965_p9 = scmp.lt.s32.totalorder %s963_s7, %s956_s24 }
  0x28   : > { %p960_p5 = pneg %p959_p4  ;;  %p966_p11 = por %p965_p9, %p964_p7 }
  0x2a   : > { %p967_p12 = pnand %p966_p11, %p960_p5 }
  0x2c   : > { %970 = shalt.err (!%p967_p12)
}
  0x2d   : > { %s1120_s10 = smov 64   ;;  %s1121_s12 = smov 4  }
  0x2e   : > { %858 = dma.hbm_to_vmem [thread:$0]  (!%p1208_p6), %s1206_s5, 1024, %s1214_s8, %s1216_s9, %s1120_s10, %s1120_s10, %s1121_s12  }
  0x2f   : > { %s1486_s2 = sld [smem:[#allocation13_spill]]  ;;  %s221_s23 = scalar_lea.vmem [#allocation6], %s749_s28 }
  0x30   : > { %s228_s24 = sshll.u32 %s221_s23, 4  ;;  %s1472_s29 = sadd.s32 4294967295, %s1117_s20   ;;  %s1258_s24 = int_to_ptr.vmem [resolvable:$true] %s228_s24 }
  0x31   : > { %p79_p10 = scmp.ne.s32.totalorder %s1101_s16, %s1097_s15  ;;  %p1265_p13 = scmp.eq.s32.totalorder %s1472_s29, 0 }
  0x32   : > { %p746_p0 = scmp.ge.s32.totalorder %s1117_s20, 1  ;;  %p170_p1 = scmp.lt.s32.totalorder %s1117_s20, 3 }
  0x33   : > { %s1487_s5 = scalar_select %p1265_p13, 1, 0 }
  0x34   : > { %p1273_p2 = por %p1265_p13, %p79_p10  ;;  %p1277_p3 = pnand %p746_p0, %p170_p1 }
  0x35   : > { %s1254_s22 = scalar_lea.hbm %s1486_s2, %s781_s26  ;;  %s1122_s15 = smov [#allocation2]  }
  0x36   : > { %s1488_s26 = scalar_select %p1273_p2, 1, 0 }
  0x37   : > { %s1489_s28 = scalar_select %p1277_p3, 1, 0 }
  0x38   : > { %s185_s8 = sshll.u32 %s1122_s15, 4  ;;  %s971_s30 = scalar_lea.hbm %s1254_s22, 1024  ;;  %s1283_s8 = int_to_ptr.vmem [resolvable:$true] %s185_s8 }
  0x39   : > { %p972_p5 = scmp.ne.s32.totalorder %s1254_s22, %s971_s30  ;;  %s976_s14 = scalar_lea.hbm %s1486_s2, 2048 }
  0x3a   : > { %p977_p11 = scmp.lt.u32.totalorder %s1254_s22, %s1486_s2  ;;  %p978_p12 = scmp.lt.u32.totalorder %s976_s14, %s971_s30 }
  0x3b   : > { %p974_p7 = pnand %p972_p5, %p1222_p8  ;;  %p980_p0 = scmp.lt.u32.totalorder %s971_s30, %s1254_s22 }
  0x3c   : > { %p979_p10 = por %p978_p12, %p977_p11 }
  0x3d   : > { %p975_p9 = pneg %p974_p7 }
  0x3e   : > { %p981_p1 = por %p980_p0, %p979_p10 }
  0x40   : > { %p982_p4 = pnand %p981_p1, %p975_p9 }
  0x42   : > { %985 = shalt.err (!%p982_p4)
}
  0x43   : > { %s986_s15 = scalar_lea.vmem %s1258_s24, 1024  ;;  %s1123_s7 = smov [#allocation6]  }
  0x44   : > { %p987_p5 = scmp.ne.s32.totalorder %s1258_s24, %s986_s15  ;;  %s991_s13 = sshll.u32 %s1123_s7, 4  ;;  %s992_s13 = int_to_ptr.vmem [resolvable:$false] %s991_s13 }
  0x45   : > { %s993_s29 = scalar_lea.vmem %s992_s13, 2048  ;;  %p994_p3 = scmp.lt.s32.totalorder %s1258_s24, %s992_s13 }
  0x46   : > { %p989_p7 = pnand %p987_p5, %p1222_p8  ;;  %p995_p13 = scmp.lt.s32.totalorder %s993_s29, %s986_s15 }
  0x48   : > { %p990_p2 = pneg %p989_p7  ;;  %p996_p11 = por %p995_p13, %p994_p3 }
  0x4a   : > { %p997_p12 = pnand %p996_p11, %p990_p2 }
  0x4c   : > { %1000 = shalt.err (!%p997_p12)
}
  0x4d   : > { %861 = dma.hbm_to_vmem [thread:$0]  (!%p1208_p6), %s1254_s22, 1024, %s1258_s24, %s1216_s9, %s1120_s10, %s1120_s10, %s1121_s12  }
  0x4e   : > { %p1490_p4 = scmp.ne.s32.totalorder %s1487_s5, 0  ;;  %p1491_p9 = scmp.ne.s32.totalorder %s1489_s28, 0 }
  0x4f   : > { %s755_s14 = sshll.u32 %s1194_s25, 3  ;;  %s756_s23 = sshll.u32 %s1113_s19, 7 }
  0x50   : > { %p1492_p10 = pneg %p1491_p9  ;;  %s1324_s13 = scalar_lea.hbm %s1470_s3, %s756_s23 }
  0x51   : > { %s1001_s2 = scalar_lea.hbm %s1467_s0, 128 }
  0x52   : > { %p1315_p0 = pnand %p1492_p10, %p1490_p4  ;;  %p1002_p13 = scmp.ne.s32.totalorder %s1467_s0, %s1001_s2 }
  0x53   : > { %p1008_p5 = scmp.lt.u32.totalorder %s1001_s2, %s1467_s0 }
  0x54   : > { %p1003_p2 = pneg %p1315_p0 }
  0x56   : > { %p1004_p3 = pnand %p1003_p2, %p1002_p13 }
  0x58   : > { %p1005_p1 = pneg %p1004_p3 }
  0x5a   : > { %p1010_p7 = pnand %p1008_p5, %p1005_p1 }
  0x5c   : > { %1013 = shalt.err (!%p1010_p7)
}
  0x5d   : > { %s1014_s24 = scalar_lea.vmem %s1283_s8, 128  ;;  %p1022_p10 = scmp.lt.s32.totalorder %s1283_s8, %s1283_s8 }
  0x5e   : > { %p1015_p11 = scmp.ne.s32.totalorder %s1283_s8, %s1014_s24  ;;  %p1023_p9 = scmp.lt.s32.totalorder %s1014_s24, %s1014_s24 }
  0x60   : > { %p1017_p12 = pnand %p1015_p11, %p1003_p2  ;;  %p1024_p6 = por %p1023_p9, %p1022_p10 }
  0x62   : > { %p1018_p4 = pneg %p1017_p12 }
  0x64   : > { %p1025_p8 = pnand %p1024_p6, %p1018_p4 }
  0x66   : > { %1028 = shalt.err (!%p1025_p8)
}
  0x67   : > { %854 = dma.hbm_to_vmem [thread:$0]  (!%p1315_p0), %s1467_s0, 128, %s1283_s8, [#allocation3]  }
  0x68   : > { %s242_s23 = scalar_lea.vmem [#allocation7], %s755_s14  ;;  %s239_s7 = scalar_lea.sflag [#allocation8], %s1194_s25 }
  0x69   : > { %s249_s15 = sshll.u32 %s242_s23, 4  ;;  %s1029_s29 = scalar_lea.hbm %s1324_s13, 128  ;;  %s250_s15 = int_to_ptr.vmem [resolvable:$true] %s249_s15 }
  0x6a   : > { %p1030_p6 = scmp.ne.s32.totalorder %s1324_s13, %s1029_s29  ;;  %p1494_p8 = scmp.ne.s32.totalorder %s1485_s11, 0 }
  0x6b   : > { %s1034_s10 = scalar_lea.hbm %s1470_s3, 256  ;;  %p1035_p2 = scmp.lt.u32.totalorder %s1324_s13, %s1470_s3 }
  0x6c   : > { %p1032_p9 = pnand %p1030_p6, %p1494_p8  ;;  %p1036_p3 = scmp.lt.u32.totalorder %s1034_s10, %s1029_s29 }
  0x6d   : > { %p1038_p0 = scmp.lt.u32.totalorder %s1029_s29, %s1324_s13 }
  0x6e   : > { %p1033_p13 = pneg %p1032_p9  ;;  %p1037_p1 = por %p1036_p3, %p1035_p2 }
  0x70   : > { %p1039_p5 = por %p1038_p0, %p1037_p1 }
  0x72   : > { %p1040_p7 = pnand %p1039_p5, %p1033_p13 }
  0x74   : > { %1043 = shalt.err (!%p1040_p7)
}
  0x75   : > { %s1044_s25 = scalar_lea.vmem %s250_s15, 128  ;;  %s1124_s8 = smov [#allocation7]  }
  0x76   : > { %p1045_p11 = scmp.ne.s32.totalorder %s250_s15, %s1044_s25  ;;  %s1049_s14 = sshll.u32 %s1124_s8, 4  ;;  %s1050_s14 = int_to_ptr.vmem [resolvable:$false] %s1049_s14 }
  0x77   : > { %s1051_s24 = scalar_lea.vmem %s1050_s14, 256  ;;  %p1052_p10 = scmp.lt.s32.totalorder %s250_s15, %s1050_s14 }
  0x78   : > { %p1047_p12 = pnand %p1045_p11, %p1494_p8  ;;  %p1053_p6 = scmp.lt.s32.totalorder %s1051_s24, %s1044_s25 }
  0x7a   : > { %p1048_p4 = pneg %p1047_p12  ;;  %p1054_p9 = por %p1053_p6, %p1052_p10 }
  0x7c   : > { %p1055_p2 = pnand %p1054_p9, %p1048_p4 }
  0x7e   : > { %1058 = shalt.err (!%p1055_p2)
}
  0x7f   : > { %p1495_p3 = scmp.ne.s32.totalorder %s1484_s6, 0  ;;  %p1496_p13 = scmp.ne.s32.totalorder %s1489_s28, 0 }
  0x80   : > { %p1497_p1 = scmp.ne.s32.totalorder (!%p1496_p13), %s1487_s5, 0 }
  0x81   : > { %864 = dma.hbm_to_vmem [thread:$0]  (!%p1495_p3), %s1324_s13, 128, %s250_s15, %s239_s7  }
  0x82   : > { %258 = sbr.rel (%p1496_p13) target bundleno = 960 (0x3c0), region = 36 }
  0x89   : > { %1084 = dma.done.wait (%p1497_p1), [#allocation3], 128  }
  0x8a   : > { %1086 = vsyncadd (%p1497_p1), [#allocation3], 4294967168  ;;  %s1498_s11 = sadd.s32 4294967295, %s1117_s20   ;;  %s266_s2 = sand.u32 1, %s1101_s16  }
  0x8b   : > { %s264_s1 = sand.u32 1, %s1498_s11   ;;  %s759_s23 = sshll.u32 %s266_s2, 6 }
  0x8c   : > { %s265_s29 = scalar_lea.sflag [#allocation5], %s264_s1  ;;  %s1374_s6 = scalar_lea.vmem [#allocation4], %s759_s23 }
  0x8d   : > { %p1499_p8 = scmp.ne.s32.totalorder %s1488_s26, 0 }
  0x8f   : > { %1088 = dma.done.wait (%p1499_p8), %s265_s29, 2048  }
  0x90   : > { %1090 = vsyncadd (%p1499_p8), %s265_s29, 4294965248  ;;  %s761_s28 = sshll.u32 %s266_s2, 3  ;;  %s1380_s13 = scalar_lea.vmem [#allocation6], %s759_s23 }
  0x91   : > { %s283_s5 = scalar_lea.sflag [#allocation8], %s266_s2  ;;  %s1382_s15 = scalar_lea.vmem [#allocation7], %s761_s28 }
  0x92   : > { %1092 = dma.done.wait (%p1499_p8), %s283_s5, 128  }
  0x93   : > { %1094 = vsyncadd (%p1499_p8), %s283_s5, 4294967168  ;;  %v1125_v0 = vmov 0.0   ;;  %vm1126_vm0 = vmmov 0   ;;  %v921_v1 = vld [vmem:[%s1374_s6] sm:$0xff]   ;;  %v922_v2 = vld [vmem:[%s1374_s6 + $0x8] sm:$0xff]   ;;  %v350_v11 = vlaneseq  ;;  %p323_p0 = scmp.lt.s32.totalorder %s1109_s18, 1 }
  0x94   : > { %801 = vmatprep.subr.bf16.mxu0 %v1125_v0  ;;  %817 = vmatprep.mubr.msk.bf16.mxu0 %vm1126_vm0, %v1125_v0  ;;  %v923_v3 = vld [vmem:[%s1374_s6 + $0x10] sm:$0xff]   ;;  %v924_v4 = vld [vmem:[%s1374_s6 + $0x18] sm:$0xff]   ;;  %v925_v5 = vld [vmem:[%s1374_s6 + $0x20] sm:$0xff]  }
  0x95   : > { %821 = vmatprep.subr.bf16.mxu1 %v1125_v0  ;;  %837 = vmatprep.mubr.msk.bf16.mxu1 %vm1126_vm0, %v1125_v0  ;;  %v926_v6 = vld [vmem:[%s1374_s6 + $0x28] sm:$0xff]   ;;  %v927_v7 = vld [vmem:[%s1374_s6 + $0x30] sm:$0xff]   ;;  %v928_v8 = vld [vmem:[%s1374_s6 + $0x38] sm:$0xff]   ;;  %v1411_v12 = vshrl.u32 %v350_v11, 7  ;;  %s1508_s18 = smov (!%p323_p0, %s1109_s18), 1 }
  0x96   : > { %802 = vmatpush3.bf16.msra.mxu0 %v921_v1  ;;  %v1406_v9 = vld [vmem:[#allocation2] sm:$0xff]  ;;  %v1415_v14 = vld [vmem:[%s1382_s15] sm:$0xff]  ;;  %v931_v24 = vld [vmem:[%s1380_s13 + $0x10] sm:$0xff]   ;;  %s762_s26 = sshll.u32 %s1508_s18, 3 }
  0x97   : > { %803 = vmatprep.subr.bf16.mxu0 %v1125_v0  ;;  %v333_v10 = vpack.c.bf16 %v1406_v9, %v1406_v9  ;;  %v352_v13 = vsub.s32 0, %v1411_v12  ;;  %v929_v22 = vld [vmem:[%s1380_s13] sm:$0xff]   ;;  %v930_v23 = vld [vmem:[%s1380_s13 + $0x8] sm:$0xff]   ;;  %v932_v25 = vld [vmem:[%s1380_s13 + $0x18] sm:$0xff]   ;;  %v459_v38 = vsub.s32 1, %v1411_v12  ;;  %v464_v39 = vsub.s32 2, %v1411_v12  ;;  %s329_s9 = scalar_lea.vmem %s1471_s4, %s762_s26 }
  0x98   : > { %822 = vmatpush3.bf16.msra.mxu1 %v929_v22  ;;  %v933_v26 = vld [vmem:[%s1380_s13 + $0x20] sm:$0xff]   ;;  %v934_v27 = vld [vmem:[%s1380_s13 + $0x28] sm:$0xff]   ;;  %v935_v28 = vld [vmem:[%s1380_s13 + $0x30] sm:$0xff]   ;;  %v487_v49 = vsub.s32 3, %v1411_v12  ;;  %v593_v1 = vsub.s32 4, %v1411_v12 }
  0x99   : > { %v353_v15 = vrot.slane %v1415_v14, %v352_v13  ;;  %823 = vmatprep.subr.bf16.mxu1 %v1125_v0  ;;  %v936_v29 = vld [vmem:[%s1380_s13 + $0x38] sm:$0xff]   ;;  %v460_v41 = vrot.slane %v1415_v14, %v459_v38  ;;  %v465_v44 = vrot.slane %v1415_v14, %v464_v39 }
  0x9a   : > { %804 = vmatpush3.bf16.msra.mxu0 %v922_v2  ;;  %v488_v50 = vrot.slane %v1415_v14, %v487_v49  ;;  %v598_v2 = vsub.s32 5, %v1411_v12 }
  0x9b   : > { %805 = vmatprep.subr.bf16.mxu0 %v1125_v0 }
  0x9c   : > { %824 = vmatpush3.bf16.msra.mxu1 %v930_v23 }
  0x9d   : > { %825 = vmatprep.subr.bf16.mxu1 %v1125_v0 }
  0x9e   : > { %806 = vmatpush3.bf16.msra.mxu0 %v923_v3 }
  0x9f   : > { %807 = vmatprep.subr.bf16.mxu0 %v1125_v0 }
  0xa0   : > { %826 = vmatpush3.bf16.msra.mxu1 %v931_v24 }
  0xa1   : > { %827 = vmatprep.subr.bf16.mxu1 %v1125_v0 }
  0xa2   : > { %808 = vmatpush3.bf16.msra.mxu0 %v924_v4  ;;  %v594_v4 = vrot.slane %v1415_v14, %v593_v1 }
  0xa3   : > { %809 = vmatprep.subr.bf16.mxu0 %v1125_v0 }
  0xa4   : > { %828 = vmatpush3.bf16.msra.mxu1 %v932_v25 }
  0xa5   : > { %829 = vmatprep.subr.bf16.mxu1 %v1125_v0 }
  0xa6   : > { %810 = vmatpush3.bf16.msra.mxu0 %v925_v5 }
  0xa7   : > { %811 = vmatprep.subr.bf16.mxu0 %v1125_v0 }
  0xa8   : > { %830 = vmatpush3.bf16.msra.mxu1 %v933_v26 }
  0xa9   : > { %831 = vmatprep.subr.bf16.mxu1 %v1125_v0 }
  0xaa   : > { %812 = vmatpush3.bf16.msra.mxu0 %v926_v6  ;;  %v599_v6 = vrot.slane %v1415_v14, %v598_v2 }
  0xab   : > { %813 = vmatprep.subr.bf16.mxu0 %v1125_v0 }
  0xac   : > { %832 = vmatpush3.bf16.msra.mxu1 %v934_v27 }
  0xad   : > { %833 = vmatprep.subr.bf16.mxu1 %v1125_v0 }
  0xae   : > { %814 = vmatpush3.bf16.msra.mxu0 %v927_v7 }
  0xaf   : > { %815 = vmatprep.subr.bf16.mxu0 %v1125_v0 }
  0xb0   : > { %834 = vmatpush3.bf16.msra.mxu1 %v935_v28 }
  0xb1   : > { %835 = vmatprep.subr.bf16.mxu1 %v1125_v0 }
  0xb2   : > { %816 = vmatpush3.bf16.msra.mxu0 %v928_v8 }
  0xb4   : > { %836 = vmatpush3.bf16.msra.mxu1 %v936_v29 }
  0xb5   : > { %818 = vmatmul.mubr.bf16.vlgmr.msra.gmra.mrb[0].mxu0 %v333_v10 }
 0x188   : > { %v436_v16 = vpop.f32.mrb[0].mxu0 }
 0x189   : > { %v437_v17 = vadd.f32 %v436_v16, %v353_v15  ;;  %v819_v18 = vpop.f32.mrb[1].mxu0 }
 0x18a   : > { %v439_v19 = vpop.f32.mrb[2].mxu0 }
 0x18b   : > { %442 = vadd.xlane.f32.xlu0 %v437_v17  ;;  %v820_v20 = vpop.f32.mrb[3].mxu0  ;;  %v446_v21 = vmul.f32 %v437_v17, %v437_v17 }
 0x18f   : > { %447 = vadd.xlane.f32.xlu0 %v446_v21 }
 0x218   : > { %v443_v30 = vpop.xlane.xlu0 %442 }
 0x219   : > { %v445_v31 = vmul.f32 0.0078125, %v443_v30 }
 0x21b   : > { %v450_v33 = vmul.f32 %v445_v31, %v445_v31  ;;  %v453_v40 = vsub.f32 %v437_v17, %v445_v31 }
 0x21c   : > { %v448_v32 = vpop.xlane.xlu0 %447 }
 0x21d   : > { %v449_v34 = vmul.f32 0.0078125, %v448_v32 }
 0x21f   : > { %v451_v35 = vsub.f32 %v449_v34, %v450_v33 }
 0x221   : > { %v452_v36 = vmax.f32 %v451_v35, 0.0 }
 0x223   : > { %v454_v37 = vadd.f32 1e-05, %v452_v36 }
 0x225   : > { %937 = vrsqrt.f32 %v454_v37 }
 0x22f   : > { %v938_v42 = vpop.eup %937 }
 0x230   : > { %v456_v43 = vmul.f32 %v938_v42, %v453_v40 }
 0x232   : > { %v461_v45 = vmul.f32 %v460_v41, %v456_v43 }
 0x234   : > { %v466_v46 = vadd.f32 %v465_v44, %v461_v45 }
 0x236   : > { %v467_v47 = vmax.f32 %v466_v46, 0.0 }
 0x238   : > { %v468_v48 = vpack.c.bf16 %v467_v47, %v467_v47 }
 0x23a   : > { %838 = vmatmul.mubr.bf16.vlgmr.msra.gmra.mrb[0].mxu1 %v468_v48 }
 0x30d   : > { %v571_v51 = vpop.f32.mrb[0].mxu1 }
 0x30e   : > { %v572_v52 = vadd.f32 %v571_v51, %v488_v50  ;;  %v839_v53 = vpop.f32.mrb[1].mxu1 }
 0x30f   : > { %v574_v54 = vpop.f32.mrb[2].mxu1 }
 0x310   : > { %577 = vadd.xlane.f32.xlu1 %v572_v52  ;;  %v840_v55 = vpop.f32.mrb[3].mxu1  ;;  %v580_v56 = vmul.f32 %v572_v52, %v572_v52 }
 0x314   : > { %581 = vadd.xlane.f32.xlu1 %v580_v56 }
 0x39d   : > { %v578_v57 = vpop.xlane.xlu1 %577 }
 0x39e   : > { %v579_v58 = vmul.f32 0.0078125, %v578_v57 }
 0x3a0   : > { %v584_v60 = vmul.f32 %v579_v58, %v579_v58  ;;  %v587_v3 = vsub.f32 %v572_v52, %v579_v58 }
 0x3a1   : > { %v582_v59 = vpop.xlane.xlu1 %581 }
 0x3a2   : > { %v583_v61 = vmul.f32 0.0078125, %v582_v59 }
 0x3a4   : > { %v585_v62 = vsub.f32 %v583_v61, %v584_v60 }
 0x3a6   : > { %v586_v63 = vmax.f32 %v585_v62, 0.0 }
 0x3a8   : > { %v588_v0 = vadd.f32 1e-05, %v586_v63 }
 0x3aa   : > { %939 = vrsqrt.f32 %v588_v0 }
 0x3b4   : > { %v940_v5 = vpop.eup %939 }
 0x3b5   : > { %v590_v7 = vmul.f32 %v940_v5, %v587_v3 }
 0x3b7   : > { %v595_v8 = vmul.f32 %v594_v4, %v590_v7 }
 0x3b9   : > { %v600_v10 = vadd.f32 %v599_v6, %v595_v8 }
 0x3bb   : > { %v601_v11 = vadd.f32 %v600_v10, %v1406_v9 }
 0x3bd   : > { %v602_v13 = vmax.f32 %v601_v11, 0.0 }
 0x3bf   : > { %603 = vst [vmem:[%s329_s9] sm:$0xff] %v602_v13 }
 0x3c0 PF: > { %s21_s20 = sadd.s32 1, %s1117_s20   ;;  %s1500_s15 = smov %s1101_s16 }
 0x3c1   : > { %p18_p5 = scmp.ge.s32.totalorder %s21_s20, 4   ;;  %s1501_s16 = smov %s1105_s17 }
 0x3c2   : > { %s1502_s17 = smov %s1198_s27  ;;  %s1503_s18 = smov %s1113_s19 }
 0x3c3   : > { %s1504_s19 = smov %s1506_s21  ;;  %20 = sbr.rel (!%p18_p5) target bundleno = 10 (0xa), region = 106 }
 0x3ca   :  { %629 = vsyncpa [#allocation3], 1 }
 0x3cb   :  { %631 = vsyncpa [#allocation3 + $0x1], 1 }
 0x3cc   :  { %632 = vsyncpa [#allocation5], 1 }
 0x3cd   :  { %634 = vsyncpa [#allocation5 + $0x1], 1 }
 0x3ce   :  { %635 = vsyncpa [#allocation8], 1 }
 0x3cf   :  { %637 = vsyncpa [#allocation8 + $0x1], 1 }

</bundles_post_ra>
